<compile_context>
chip_gen: v6e
topology: v6e:2x2x1
jax: 0.10.0
libtpu: 0.0.40
codegen_flags: <defaults>
</compile_context>

<pallas_src>
import functools

import jax
import jax.numpy as jnp
from jax.experimental import pallas as pl
from jax.experimental.pallas import tpu as pltpu


def _upsample_conv_kernel(x_ref, m_ref, b_ref, gsum_ref, gexp_ref,
                          gamma_ref, beta_ref, o_ref, xp_ref,
                          *, H, W, Cin, dim, eps):
    """Fused conv3x3 + PixelShuffle(2) + LayerNorm for one batch element.

    All operands are lane-dense (W folded into the lane axis):
      x_ref     : (H, W*Cin)          input rows, NHWC flattened over (W, Cin)
      m_ref     : (3*W*Cin, 4*W*dim)  banded conv matrix; rows = (ky, w_in, ci),
                                      cols = (i, w, j, c)  (subpixel-major)
      b_ref     : (1, 4*W*dim)        conv bias tiled to the output lane order
      gsum_ref  : (4*W*dim, 4*W)      per-pixel group-mean matrix (1/dim entries)
      gexp_ref  : (4*W, 4*W*dim)      group broadcast-back matrix (0/1 entries)
      gamma_ref : (1, 4*W*dim)        LayerNorm gamma tiled per output pixel
      beta_ref  : (1, 4*W*dim)        LayerNorm beta  tiled per output pixel
      o_ref     : (2H, 2W*dim)        output rows, NHWC flattened over (2W, dim)
      xp_ref    : (H+2, W*Cin) f32    scratch: row-padded copy of the input
    """
    K = W * Cin
    f32 = jnp.float32

    # Row-pad the input once in VMEM (no HBM pad pass; the W border is handled
    # by the banded matrix, which simply omits out-of-range kx taps).
    xp_ref[0:1, :] = jnp.zeros((1, K), f32)
    xp_ref[H + 1:H + 2, :] = jnp.zeros((1, K), f32)
    xp_ref[1:H + 1, :] = x_ref[...].astype(f32)

    # 3x3 "same" conv as ONE MXU matmul: lhs lanes are (ky, w_in, ci); the
    # banded matrix routes each tap to its output column.  Building lhs is
    # three 128-lane-aligned copies — no im2col / (H*W, C) fold relayout.
    lhs = jnp.concatenate(
        [xp_ref[0:H, :], xp_ref[1:H + 1, :], xp_ref[2:H + 2, :]], axis=1)
    acc = jnp.dot(lhs, m_ref[...].astype(f32),
                  preferred_element_type=f32) + b_ref[...].astype(f32)

    # LayerNorm over each output pixel's `dim` channels.  With lane order
    # (i, w, j, c), every group of `dim` consecutive lanes is one output pixel,
    # so mean / broadcast-back are two small MXU matmuls (no lane->sublane
    # relayout for the reduction).
    gsum = gsum_ref[...]
    gexp = gexp_ref[...]
    mu = jnp.dot(jnp.dot(acc, gsum, preferred_element_type=f32),
                 gexp, preferred_element_type=f32)
    d = acc - mu
    var = jnp.dot(jnp.dot(d * d, gsum, preferred_element_type=f32),
                  gexp, preferred_element_type=f32)
    yn = d * jax.lax.rsqrt(var + eps)
    yn = yn * gamma_ref[...].astype(f32) + beta_ref[...].astype(f32)

    # PixelShuffle(2) + permute back to NHWC are free: the first half of each
    # row holds output row 2h (i=0), the second half row 2h+1 (i=1), so a plain
    # row-split reshape finishes the shuffle into the lane-dense output slab.
    o_ref[...] = yn.reshape(2 * H, 2 * W * dim).astype(o_ref.dtype)


def upsample_conv_forward(x, conv_w, conv_b, ln_gamma, ln_beta, *, eps=1e-5):
    """JAX/Pallas forward of `Upsample_conv`.

    x        : (B, H, W, 2*dim)      NHWC (as in the PyTorch module docstring)
    conv_w   : (4*dim, 2*dim, 3, 3)  PyTorch OIHW conv weight
    conv_b   : (4*dim,)
    ln_gamma : (dim,)
    ln_beta  : (dim,)
    returns  : (B, 2H, 2W, dim)
    """
    B, H, W, Cin = x.shape
    Cout = conv_w.shape[0]
    dim = Cout // 4
    assert Cin == 2 * dim and conv_w.shape == (Cout, Cin, 3, 3)
    out_dtype = x.dtype
    f32 = jnp.float32

    K = W * Cin      # conv-matmul contraction lanes per ky
    N = 4 * W * dim  # output lanes per conv row (= W * Cout)
    G = 4 * W        # LayerNorm groups (= output pixels) per conv row

    # --- banded conv matrix (built once per call, plain-JAX glue) -------------
    # PyTorch PixelShuffle channel order: o = c*4 + 2*i + j.
    # Kernel output lane order:           lane = i*(2*W*dim) + w*(2*dim) + j*dim + c.
    w_r = conv_w.astype(f32).reshape(dim, 2, 2, Cin, 3, 3)      # (c, i, j, ci, ky, kx)
    w_r = jnp.transpose(w_r, (4, 5, 3, 1, 2, 0))                # (ky, kx, ci, i, j, c)
    wi = jnp.arange(W)
    # S[kx, w_in, w] = 1 iff input column w_in feeds output column w at tap kx.
    S = (wi[None, :, None]
         == wi[None, None, :] + jnp.arange(3)[:, None, None] - 1).astype(f32)
    M = jnp.einsum('xnw,yxeabd->yneawbd', S, w_r)               # (ky, w_in, ci, i, w, j, c)
    M = M.reshape(3 * K, N)

    # --- bias / LayerNorm params tiled to the output lane order ---------------
    b_r = jnp.transpose(conv_b.astype(f32).reshape(dim, 2, 2), (1, 2, 0))   # (i, j, c)
    bias = jnp.broadcast_to(b_r[:, None, :, :], (2, W, 2, dim)).reshape(1, N)
    gamma = jnp.tile(ln_gamma.astype(f32), G).reshape(1, N)
    beta = jnp.tile(ln_beta.astype(f32), G).reshape(1, N)

    grp = jnp.arange(N) // dim
    gsum = (grp[:, None] == jnp.arange(G)[None, :]).astype(f32) / dim       # (N, G)
    gexp = (jnp.arange(G)[:, None] == grp[None, :]).astype(f32)             # (G, N)

    # Lane-dense view of the input (metadata-only reshape, no HBM pass).
    x2d = x.reshape(B, H, K)

    kernel = functools.partial(_upsample_conv_kernel,
                               H=H, W=W, Cin=Cin, dim=dim, eps=eps)

    itemsize = jnp.dtype(x.dtype).itemsize
    flops = 2 * B * H * (3 * K) * N + 2 * 4 * B * H * N * G
    bytes_accessed = int(
        x2d.size * itemsize
        + (M.size + bias.size + gsum.size + gexp.size + gamma.size + beta.size) * 4
        + B * 2 * H * 2 * W * dim * jnp.dtype(out_dtype).itemsize)

    # TODO(synk): the banded matrix is O(W^2 * Cin * Cout); for large W, tile
    # the W axis (block-banded tiles with a one-column halo) or fall back to
    # per-tap (H*W, Cin) matmuls once W*Cin exceeds a few vregs of lanes.
    out2d = pl.pallas_call(
        kernel,
        out_shape=jax.ShapeDtypeStruct((B, 2 * H, 2 * W * dim), out_dtype),
        grid=(B,),
        in_specs=[
            pl.BlockSpec((None, H, K), lambda i: (i, 0, 0)),
            pl.BlockSpec((3 * K, N), lambda i: (0, 0)),
            pl.BlockSpec((1, N), lambda i: (0, 0)),
            pl.BlockSpec((N, G), lambda i: (0, 0)),
            pl.BlockSpec((G, N), lambda i: (0, 0)),
            pl.BlockSpec((1, N), lambda i: (0, 0)),
            pl.BlockSpec((1, N), lambda i: (0, 0)),
        ],
        out_specs=pl.BlockSpec((None, 2 * H, 2 * W * dim), lambda i: (i, 0, 0)),
        scratch_shapes=[pltpu.VMEM((H + 2, K), jnp.float32)],
        compiler_params=pltpu.CompilerParams(
            dimension_semantics=("parallel",),
            vmem_limit_bytes=64 * 1024 * 1024,
        ),
        cost_estimate=pl.CostEstimate(
            flops=flops,
            transcendentals=B * H * N,
            bytes_accessed=bytes_accessed,
        ),
    )(x2d, M, bias, gsum, gexp, gamma, beta)

    # Free (metadata-only) reshape back to NHWC (B, 2H, 2W, dim).
    return out2d.reshape(B, 2 * H, 2 * W, dim)


class UpsampleConv:
    """JAX/Pallas mirror of the PyTorch `Upsample_conv` module."""

    def __init__(self, conv_w, conv_b, ln_gamma, ln_beta, eps=1e-5):
        self.conv_w, self.conv_b = conv_w, conv_b
        self.ln_gamma, self.ln_beta = ln_gamma, ln_beta
        self.eps = eps

    def __call__(self, x):
        return upsample_conv_forward(x, self.conv_w, self.conv_b,
                                     self.ln_gamma, self.ln_beta, eps=self.eps)


def _reference_forward(x, conv_w, conv_b, gamma, beta, eps=1e-5):
    """Pure-JAX (XLA) reference of the PyTorch forward for verification."""
    dim = conv_w.shape[0] // 4
    xn = jnp.transpose(x, (0, 3, 1, 2))                       # NCHW
    y = jax.lax.conv_general_dilated(
        xn, conv_w, window_strides=(1, 1), padding=((1, 1), (1, 1)),
        dimension_numbers=("NCHW", "OIHW", "NCHW"),
        precision=jax.lax.Precision.HIGHEST)
    y = y + conv_b[None, :, None, None]
    B, C, H, W = y.shape
    y = y.reshape(B, dim, 2, 2, H, W)                         # PixelShuffle(2)
    y = jnp.transpose(y, (0, 1, 4, 2, 5, 3)).reshape(B, dim, 2 * H, 2 * W)
    y = jnp.transpose(y, (0, 2, 3, 1))                        # NHWC
    mu = jnp.mean(y, axis=-1, keepdims=True)
    var = jnp.mean((y - mu) ** 2, axis=-1, keepdims=True)
    return (y - mu) * jax.lax.rsqrt(var + eps) * gamma + beta


if __name__ == "__main__":
    key = jax.random.PRNGKey(0)
    dim = 4
    B, H, W = 2, 16, 16
    Cin, Cout = 2 * dim, 4 * dim
    k1, k2, k3, k4, k5 = jax.random.split(key, 5)

    # Quantize values so they are exactly representable in bf16: the MXU and the
    # f32 reference then agree to float32 accumulation error.
    def q(k, shape, scale=1.0):
        return jnp.round(jax.random.normal(k, shape, jnp.float32) * 8.0) / 8.0 * scale

    x = q(k1, (B, H, W, Cin))
    conv_w = q(k2, (Cout, Cin, 3, 3), 0.25)
    conv_b = q(k3, (Cout,), 0.25)
    ln_gamma = 1.0 + q(k4, (dim,), 0.25)
    ln_beta = q(k5, (dim,), 0.25)

    mod = UpsampleConv(conv_w, conv_b, ln_gamma, ln_beta)
    out = jax.block_until_ready(mod(x))

    ref = _reference_forward(x, conv_w, conv_b, ln_gamma, ln_beta)
    assert out.shape == (B, 2 * H, 2 * W, dim), out.shape
    assert out.shape == ref.shape and out.dtype == ref.dtype
    err = float(jnp.max(jnp.abs(out - ref)))
    assert err < 1e-3, f"max abs err {err}"

    print("KERNEL_OK")
</pallas_src>

<mosaic_0001>
module attributes {stable_mosaic.version = 11 : i64} {
  func.func @_upsample_conv_kernel(%arg0: i32, %arg1: memref<1x16x128xf32, #tpu.memory_space<vmem>>, %arg2: memref<384x256xf32, #tpu.memory_space<vmem>>, %arg3: memref<1x256xf32, #tpu.memory_space<vmem>>, %arg4: memref<256x64xf32, #tpu.memory_space<vmem>>, %arg5: memref<64x256xf32, #tpu.memory_space<vmem>>, %arg6: memref<1x256xf32, #tpu.memory_space<vmem>>, %arg7: memref<1x256xf32, #tpu.memory_space<vmem>>, %arg8: memref<1x32x128xf32, #tpu.memory_space<vmem>>, %arg9: memref<18x128xf32, #tpu.memory_space<vmem>>) attributes {dimension_semantics = [#tpu.dimension_semantics<parallel>], iteration_bounds = array<i64: 2>, scalar_prefetch = 0 : i64, scratch_operands = 1 : i64, tpu.core_type = #tpu.core_type<tc>, window_params = [{transform_indices = @transform_0, window_bounds = array<i64: 1, 16, 128>}, {pipeline_mode = #tpu.pipeline_mode<synchronous>, transform_indices = @transform_1, window_bounds = array<i64: 384, 256>}, {pipeline_mode = #tpu.pipeline_mode<synchronous>, transform_indices = @transform_2, window_bounds = array<i64: 1, 256>}, {pipeline_mode = #tpu.pipeline_mode<synchronous>, transform_indices = @transform_3, window_bounds = array<i64: 256, 64>}, {pipeline_mode = #tpu.pipeline_mode<synchronous>, transform_indices = @transform_4, window_bounds = array<i64: 64, 256>}, {pipeline_mode = #tpu.pipeline_mode<synchronous>, transform_indices = @transform_5, window_bounds = array<i64: 1, 256>}, {pipeline_mode = #tpu.pipeline_mode<synchronous>, transform_indices = @transform_6, window_bounds = array<i64: 1, 256>}, {transform_indices = @transform_7, window_bounds = array<i64: 1, 32, 128>}]} {
    %cst = arith.constant 0.000000e+00 : f32
    %0 = vector.broadcast %cst : f32 to vector<1x128xf32>
    %c0 = arith.constant 0 : index
    %c0_0 = arith.constant 0 : index
    %1 = vector.load %arg9[%c0, %c0_0] : memref<18x128xf32, #tpu.memory_space<vmem>>, vector<1x128xf32>
    tpu.vector_store %arg9[%c0, %c0_0], %0 {strides = array<i32>} : memref<18x128xf32, #tpu.memory_space<vmem>>, vector<1x128xf32>,
    %cst_1 = arith.constant 0.000000e+00 : f32
    %2 = vector.broadcast %cst_1 : f32 to vector<1x128xf32>
    %c17 = arith.constant 17 : index
    %c0_2 = arith.constant 0 : index
    %3 = vector.load %arg9[%c17, %c0_2] : memref<18x128xf32, #tpu.memory_space<vmem>>, vector<1x128xf32>
    tpu.vector_store %arg9[%c17, %c0_2], %2 {strides = array<i32>} : memref<18x128xf32, #tpu.memory_space<vmem>>, vector<1x128xf32>,
    %c0_3 = arith.constant 0 : index
    %c0_4 = arith.constant 0 : index
    %c0_5 = arith.constant 0 : index
    %4 = vector.load %arg1[%c0_3, %c0_4, %c0_5] : memref<1x16x128xf32, #tpu.memory_space<vmem>>, vector<1x16x128xf32>
    %5 = vector.shape_cast %4 : vector<1x16x128xf32> to vector<16x128xf32>
    %c1 = arith.constant 1 : index
    %c0_6 = arith.constant 0 : index
    %6 = vector.load %arg9[%c1, %c0_6] : memref<18x128xf32, #tpu.memory_space<vmem>>, vector<16x128xf32>
    tpu.vector_store %arg9[%c1, %c0_6], %5 {strides = array<i32>} : memref<18x128xf32, #tpu.memory_space<vmem>>, vector<16x128xf32>,
    %c0_7 = arith.constant 0 : index
    %c0_8 = arith.constant 0 : index
    %7 = vector.load %arg9[%c0_7, %c0_8] : memref<18x128xf32, #tpu.memory_space<vmem>>, vector<16x128xf32>
    %c1_9 = arith.constant 1 : index
    %c0_10 = arith.constant 0 : index
    %8 = vector.load %arg9[%c1_9, %c0_10] : memref<18x128xf32, #tpu.memory_space<vmem>>, vector<16x128xf32>
    %c2 = arith.constant 2 : index
    %c0_11 = arith.constant 0 : index
    %9 = vector.load %arg9[%c2, %c0_11] : memref<18x128xf32, #tpu.memory_space<vmem>>, vector<16x128xf32>
    %10 = tpu.concatenate %7, %8, %9 in 1 : vector<16x128xf32>, vector<16x128xf32>, vector<16x128xf32> -> vector<16x384xf32>
    %c0_12 = arith.constant 0 : index
    %c0_13 = arith.constant 0 : index
    %11 = vector.load %arg2[%c0_12, %c0_13] : memref<384x256xf32, #tpu.memory_space<vmem>>, vector<384x256xf32>
    %cst_14 = arith.constant dense<0.000000e+00> : vector<16x256xf32>
    %12 = tpu.matmul %10, %11, %cst_14 {dimension_numbers = #tpu.dot_dimension_numbers<[1], [0], [0], [1], [0, 0, 1, 1], [], []>} : vector<16x384xf32>, vector<384x256xf32>, vector<16x256xf32> -> vector<16x256xf32>
    %c0_15 = arith.constant 0 : index
    %c0_16 = arith.constant 0 : index
    %13 = vector.load %arg3[%c0_15, %c0_16] : memref<1x256xf32, #tpu.memory_space<vmem>>, vector<1x256xf32>
    %14 = vector.broadcast %13 : vector<1x256xf32> to vector<16x256xf32>
    %15 = arith.addf %12, %14 : vector<16x256xf32>
    %c0_17 = arith.constant 0 : index
    %c0_18 = arith.constant 0 : index
    %16 = vector.load %arg4[%c0_17, %c0_18] : memref<256x64xf32, #tpu.memory_space<vmem>>, vector<256x64xf32>
    %c0_19 = arith.constant 0 : index
    %c0_20 = arith.constant 0 : index
    %17 = vector.load %arg5[%c0_19, %c0_20] : memref<64x256xf32, #tpu.memory_space<vmem>>, vector<64x256xf32>
    %cst_21 = arith.constant dense<0.000000e+00> : vector<16x64xf32>
    %18 = tpu.matmul %15, %16, %cst_21 {dimension_numbers = #tpu.dot_dimension_numbers<[1], [0], [0], [1], [0, 0, 1, 1], [], []>} : vector<16x256xf32>, vector<256x64xf32>, vector<16x64xf32> -> vector<16x64xf32>
    %cst_22 = arith.constant dense<0.000000e+00> : vector<16x256xf32>
    %19 = tpu.matmul %18, %17, %cst_22 {dimension_numbers = #tpu.dot_dimension_numbers<[1], [0], [0], [1], [0, 0, 1, 1], [], []>} : vector<16x64xf32>, vector<64x256xf32>, vector<16x256xf32> -> vector<16x256xf32>
    %20 = arith.subf %15, %19 : vector<16x256xf32>
    %21 = arith.mulf %20, %20 : vector<16x256xf32>
    %cst_23 = arith.constant dense<0.000000e+00> : vector<16x64xf32>
    %22 = tpu.matmul %21, %16, %cst_23 {dimension_numbers = #tpu.dot_dimension_numbers<[1], [0], [0], [1], [0, 0, 1, 1], [], []>} : vector<16x256xf32>, vector<256x64xf32>, vector<16x64xf32> -> vector<16x64xf32>
    %cst_24 = arith.constant dense<0.000000e+00> : vector<16x256xf32>
    %23 = tpu.matmul %22, %17, %cst_24 {dimension_numbers = #tpu.dot_dimension_numbers<[1], [0], [0], [1], [0, 0, 1, 1], [], []>} : vector<16x64xf32>, vector<64x256xf32>, vector<16x256xf32> -> vector<16x256xf32>
    %cst_25 = arith.constant 9.99999974E-6 : f32
    %24 = vector.broadcast %cst_25 : f32 to vector<16x256xf32>
    %25 = arith.addf %23, %24 : vector<16x256xf32>
    %26 = math.rsqrt %25 : vector<16x256xf32>
    %27 = arith.mulf %20, %26 : vector<16x256xf32>
    %c0_26 = arith.constant 0 : index
    %c0_27 = arith.constant 0 : index
    %28 = vector.load %arg6[%c0_26, %c0_27] : memref<1x256xf32, #tpu.memory_space<vmem>>, vector<1x256xf32>
    %29 = vector.broadcast %28 : vector<1x256xf32> to vector<16x256xf32>
    %30 = arith.mulf %27, %29 : vector<16x256xf32>
    %c0_28 = arith.constant 0 : index
    %c0_29 = arith.constant 0 : index
    %31 = vector.load %arg7[%c0_28, %c0_29] : memref<1x256xf32, #tpu.memory_space<vmem>>, vector<1x256xf32>
    %32 = vector.broadcast %31 : vector<1x256xf32> to vector<16x256xf32>
    %33 = arith.addf %30, %32 : vector<16x256xf32>
    %34 = vector.shape_cast %33 : vector<16x256xf32> to vector<32x128xf32>
    %c0_30 = arith.constant 0 : index
    %c0_31 = arith.constant 0 : index
    %c0_32 = arith.constant 0 : index
    %35 = vector.load %arg8[%c0_30, %c0_31, %c0_32] : memref<1x32x128xf32, #tpu.memory_space<vmem>>, vector<1x32x128xf32>
    %36 = vector.shape_cast %35 : vector<1x32x128xf32> to vector<32x128xf32>
    %37 = vector.shape_cast %34 : vector<32x128xf32> to vector<1x32x128xf32>
    tpu.vector_store %arg8[%c0_30, %c0_31, %c0_32], %37 {strides = array<i32>} : memref<1x32x128xf32, #tpu.memory_space<vmem>>, vector<1x32x128xf32>,
    return
  }
  func.func @transform_0(%arg0: i32) -> (i32, i32, i32) {
    %c0_i32 = arith.constant 0 : i32
    %c0_i32_0 = arith.constant 0 : i32
    %c0_i32_1 = arith.constant 0 : i32
    return %arg0, %c0_i32, %c0_i32_0 : i32, i32, i32
  }
  func.func @transform_1(%arg0: i32) -> (i32, i32) {
    %c0_i32 = arith.constant 0 : i32
    %c0_i32_0 = arith.constant 0 : i32
    %c0_i32_1 = arith.constant 0 : i32
    return %c0_i32, %c0_i32_0 : i32, i32
  }
  func.func @transform_2(%arg0: i32) -> (i32, i32) {
    %c0_i32 = arith.constant 0 : i32
    %c0_i32_0 = arith.constant 0 : i32
    %c0_i32_1 = arith.constant 0 : i32
    return %c0_i32, %c0_i32_0 : i32, i32
  }
  func.func @transform_3(%arg0: i32) -> (i32, i32) {
    %c0_i32 = arith.constant 0 : i32
    %c0_i32_0 = arith.constant 0 : i32
    %c0_i32_1 = arith.constant 0 : i32
    return %c0_i32, %c0_i32_0 : i32, i32
  }
  func.func @transform_4(%arg0: i32) -> (i32, i32) {
    %c0_i32 = arith.constant 0 : i32
    %c0_i32_0 = arith.constant 0 : i32
    %c0_i32_1 = arith.constant 0 : i32
    return %c0_i32, %c0_i32_0 : i32, i32
  }
  func.func @transform_5(%arg0: i32) -> (i32, i32) {
    %c0_i32 = arith.constant 0 : i32
    %c0_i32_0 = arith.constant 0 : i32
    %c0_i32_1 = arith.constant 0 : i32
    return %c0_i32, %c0_i32_0 : i32, i32
  }
  func.func @transform_6(%arg0: i32) -> (i32, i32) {
    %c0_i32 = arith.constant 0 : i32
    %c0_i32_0 = arith.constant 0 : i32
    %c0_i32_1 = arith.constant 0 : i32
    return %c0_i32, %c0_i32_0 : i32, i32
  }
  func.func @transform_7(%arg0: i32) -> (i32, i32, i32) {
    %c0_i32 = arith.constant 0 : i32
    %c0_i32_0 = arith.constant 0 : i32
    %c0_i32_1 = arith.constant 0 : i32
    return %arg0, %c0_i32, %c0_i32_0 : i32, i32, i32
  }
}

</mosaic_0001>

<bundles_post_ra>
// kernel: tpu_custom_call.1
= control target key start
LH: loop header
LB: loop body
LE: loop exit
PB: predicated region body
PF: predicated region fallthrough
CT: control target
= control target key end

     0   :  { %12 = vsyncpa [#allocation4], 0  ;;  %s1909_s0 = inlined_call_operand.vmem [shape: f32[2,16,128], index: 0, kind: input, shape index: {}]   ;;  %s1910_s1 = inlined_call_operand.hbm [shape: f32[384,256], index: 1, kind: input, shape index: {}]   ;;  %s1911_s2 = inlined_call_operand.vmem [shape: f32[1,256], index: 2, kind: input, shape index: {}]   ;;  %s1912_s3 = inlined_call_operand.vmem [shape: f32[256,64], index: 3, kind: input, shape index: {}]   ;;  %s1913_s4 = inlined_call_operand.vmem [shape: f32[64,256], index: 4, kind: input, shape index: {}]   ;;  %s1914_s5 = inlined_call_operand.vmem [shape: f32[1,256], index: 5, kind: input, shape index: {}]   ;;  %s1915_s6 = inlined_call_operand.vmem [shape: f32[1,256], index: 6, kind: input, shape index: {}]   ;;  %s1916_s7 = inlined_call_operand.hbm [shape: f32[2,32,128], index: 7, kind: output, shape index: {}]  }
   0x1   :  { %13 = vsyncpa [#allocation5], 0 }
   0x2   :  { %15 = vsyncpa [#allocation5 + $0x1], 0  ;;  %s1413_s24 = smov 0   ;;  %s1415_s25 = smov 0  }
   0x3   :  { %s1417_s26 = smov 0   ;;  %s1419_s27 = smov 0  }
   0x4 LB: > { %s1434_s28 = sadd.s32 4294967295, %s1364_s27   ;;  %s1111_s29 = sadd.s32 4294967294, %s1364_s27   ;;  %s1364_s27 = sphi %s1419_s27, %s1924_s27   ;;  %s1360_s26 = sphi %s1417_s26, %s1923_s26   ;;  %s1356_s25 = sphi %s1415_s25, %s1922_s25   ;;  %s1352_s24 = sphi %s1413_s24, %s1921_s24  }
   0x5   : > { %s1438_s30 = sadd.s32 1, %s1364_s27   ;;  %s180_s8 = sadd.s32 1, %s1360_s26 }
   0x6   : > { %s177_s9 = ssub.s32 %s1364_s27, %s1438_s30  ;;  %p190_p0 = scmp.ne.s32.totalorder %s1360_s26, %s1356_s25 }
   0x7   : > { %p178_p1 = scmp.eq.s32.totalorder %s177_s9, 0  ;;  %p191_p2 = scmp.eq.s32.totalorder %s1434_s28, 1 }
   0x8   : > { %p196_p3 = scmp.ne.s32.totalorder %s1356_s25, %s1352_s24  ;;  %p197_p4 = scmp.eq.s32.totalorder %s1111_s29, 1 }
   0x9   : > { %s1449_s10 = scalar_select %p178_p1, %s1360_s26, %s180_s8  }
   0xa   : > { %p1451_p5 = por %p191_p2, %p190_p0  ;;  %p1455_p6 = por %p197_p4, %p196_p3 }
   0xb   : > { %p1112_p7 = scmp.ge.s32.totalorder %s1364_s27, 1  ;;  %p204_p8 = scmp.lt.s32.totalorder %s1364_s27, 3 }
   0xc   : > { %s1918_s12 = scalar_select %p1455_p6, 1, 0 }
   0xd   : > { %p1225_p9 = scmp.eq.s32.totalorder %s1434_s28, 0  ;;  %p1462_p10 = pnand %p1112_p7, %p204_p8 }
   0xe   : > { %s1366_s14 = smov [#allocation3]  }
   0xf   : > { %s216_s15 = sshll.u32 %s1366_s14, 4  ;;  %p1217_p11 = pneg %p1462_p10  ;;  %s217_s15 = int_to_ptr.vmem [resolvable:$true] %s216_s15 }
  0x10   : > { %s1285_s16 = scalar_lea.vmem %s217_s15, 12288  ;;  %p1293_p3 = scmp.lt.s32.totalorder %s217_s15, %s217_s15 }
  0x11   : > { %p1218_p12 = pnand %p1225_p9, %p1217_p11  ;;  %p1286_p0 = scmp.ne.s32.totalorder %s217_s15, %s1285_s16 }
  0x12   : > { %p1294_p4 = scmp.lt.s32.totalorder %s1285_s16, %s1285_s16 }
  0x13   : > { %p1276_p13 = pneg %p1218_p12 }
  0x14   : > { %p1295_p6 = por %p1294_p4, %p1293_p3 }
  0x15   : > { %p1288_p1 = pnand %p1286_p0, %p1276_p13 }
  0x17   : > { %p1289_p2 = pneg %p1288_p1 }
  0x19   : > { %p1296_p7 = pnand %p1295_p6, %p1289_p2 }
  0x1b   : > { %1299 = shalt.err (!%p1296_p7)
}
  0x1c   : > { %s1367_s17 = smov 256   ;;  %s1368_s18 = smov 16  }
  0x1d   : > { %1220 = dma.hbm_to_vmem [thread:$0]  (!%p1218_p12), %s1910_s1, 12288, %s217_s15, [#allocation4], %s1367_s17, %s1367_s17, %s1368_s18  }
  0x1e   : > { %255 = sbr.rel (%p1462_p10) target bundleno = 1132 (0x46c), region = 48 }
  0x23   : > { %1343 = dma.done.wait (%p1225_p9), [#allocation4], 12288  }
  0x24   : > { %1345 = vsyncadd (%p1225_p9), [#allocation4], 4294955008  ;;  %v1369_v0 = vmov 0.0   ;;  %v335_v1 = vld [vmem:[#allocation3 + $0xf8] sm:$0xff]  ;;  %v334_v2 = vld [vmem:[#allocation3 + $0xf0] sm:$0xff]  ;;  %p287_p6 = scmp.lt.s32.totalorder %s1434_s28, 1 }
  0x25   : > { %292 = vst [vmem:[#allocation2] sm:$0x1] %v1369_v0  ;;  %293 = vst [vmem:[#allocation2 + $0x11] sm:$0x1] %v1369_v0  ;;  %553 = vmatprep.mubr.f32.mxu1 %v1369_v0  ;;  %v333_v3 = vld [vmem:[#allocation3 + $0xe8] sm:$0xff]  ;;  %412 = vmatprep.subr.mxu0 %v335_v1  ;;  %v332_v4 = vld [vmem:[#allocation3 + $0xe0] sm:$0xff] }
  0x26   : > { %413 = vmatpush1.msra.mxu0 %v334_v2  ;;  %v331_v5 = vld [vmem:[#allocation3 + $0xd8] sm:$0xff]  ;;  %v330_v6 = vld [vmem:[#allocation3 + $0xd0] sm:$0xff]  ;;  %v329_v7 = vld [vmem:[#allocation3 + $0xc8] sm:$0xff]  ;;  %s1486_s21 = scalar_select %p287_p6, %s1434_s28, 1  ;;  %vm689_vm0 = vcmask 523264  }
  0x27   : > { %414 = vmatprep.subr.mxu0 %v333_v3  ;;  %v328_v8 = vld [vmem:[#allocation3 + $0xc0] sm:$0xff]  ;;  %v327_v9 = vld [vmem:[#allocation3 + $0xb8] sm:$0xff]  ;;  %v326_v10 = vld [vmem:[#allocation3 + $0xb0] sm:$0xff]  ;;  %s284_s16 = sand.u32 1, %s1356_s25   ;;  %s1134_s18 = sshll.u32 %s1434_s28, 9 }
  0x28   : > { %415 = vmatpush1.msra.mxu0 %v332_v4  ;;  %v325_v11 = vld [vmem:[#allocation3 + $0xa8] sm:$0xff]  ;;  %v324_v12 = vld [vmem:[#allocation3 + $0xa0] sm:$0xff]  ;;  %v323_v13 = vld [vmem:[#allocation3 + $0x98] sm:$0xff]  ;;  %s1133_s22 = sshll.u32 %s1486_s21, 4  ;;  %s1117_s17 = sshll.u32 %s284_s16, 5 }
  0x29   : > { %416 = vmatprep.subr.mxu0 %v331_v5  ;;  %v322_v14 = vld [vmem:[#allocation3 + $0x90] sm:$0xff]  ;;  %v399_v15 = vld [vmem:[#allocation3 + $0x2f8] sm:$0xff]  ;;  %v321_v17 = vld [vmem:[#allocation3 + $0x88] sm:$0xff]  ;;  %s291_s8 = scalar_lea.vmem %s1909_s0, %s1133_s22  ;;  %s286_s19 = scalar_lea.vmem [#allocation6], %s1117_s17 }
  0x2a   : > { %417 = vmatpush1.msra.mxu0 %v330_v6  ;;  %v398_v16 = vld [vmem:[#allocation3 + $0x2f0] sm:$0xff]  ;;  %489 = vmatprep.subr.mxu1 %v399_v15  ;;  %v397_v18 = vld [vmem:[#allocation3 + $0x2e8] sm:$0xff]  ;;  %v320_v19 = vld [vmem:[#allocation3 + $0x80] sm:$0xff]  ;;  %s1037_s20 = sshll.u32 %s286_s19, 4  ;;  %s1863_s23 = scalar_lea.hbm %s1916_s7, %s1134_s18  ;;  %s1865_s20 = int_to_ptr.vmem [resolvable:$true] %s1037_s20 }
  0x2b   : > { %418 = vmatprep.subr.mxu0 %v329_v7  ;;  %490 = vmatpush1.msra.mxu1 %v398_v16  ;;  %v396_v20 = vld [vmem:[#allocation3 + $0x2e0] sm:$0xff]  ;;  %v395_v21 = vld [vmem:[#allocation3 + $0x2d8] sm:$0xff]  ;;  %v394_v23 = vld [vmem:[#allocation3 + $0x2d0] sm:$0xff]  ;;  %s1869_s28 = scalar_lea.sflag [#allocation5], %s284_s16  ;;  %s1300_s29 = scalar_lea.vmem %s1865_s20, 512 }
  0x2c   : > { %419 = vmatpush1.msra.mxu0 %v328_v8  ;;  %v319_v22 = vld [vmem:[#allocation3 + $0x78] sm:$0xff]  ;;  %491 = vmatprep.subr.mxu1 %v397_v18  ;;  %v318_v24 = vld [vmem:[#allocation3 + $0x70] sm:$0xff]  ;;  %v393_v25 = vld [vmem:[#allocation3 + $0x2c8] sm:$0xff]  ;;  %p1301_p8 = scmp.ne.s32.totalorder %s1865_s20, %s1300_s29 }
  0x2d   : > { %420 = vmatprep.subr.mxu0 %v327_v9  ;;  %492 = vmatpush1.msra.mxu1 %v396_v20  ;;  %v317_v26 = vld [vmem:[#allocation3 + $0x68] sm:$0xff]  ;;  %v392_v27 = vld [vmem:[#allocation3 + $0x2c0] sm:$0xff]  ;;  %v391_v29 = vld [vmem:[#allocation3 + $0x2b8] sm:$0xff] }
  0x2e   : > { %421 = vmatpush1.msra.mxu0 %v326_v10  ;;  %493 = vmatprep.subr.mxu1 %v395_v21  ;;  %v316_v28 = vld [vmem:[#allocation3 + $0x60] sm:$0xff]  ;;  %v315_v30 = vld [vmem:[#allocation3 + $0x58] sm:$0xff]  ;;  %v390_v31 = vld [vmem:[#allocation3 + $0x2b0] sm:$0xff]  ;;  %p1302_p9 = pnand %p1301_p8, %p1451_p5 }
  0x2f   : > { %422 = vmatprep.subr.mxu0 %v325_v11  ;;  %494 = vmatpush1.msra.mxu1 %v394_v23  ;;  %v314_v32 = vld [vmem:[#allocation3 + $0x50] sm:$0xff]  ;;  %v389_v33 = vld [vmem:[#allocation3 + $0x2a8] sm:$0xff]  ;;  %v388_v35 = vld [vmem:[#allocation3 + $0x2a0] sm:$0xff] }
  0x30   : > { %423 = vmatpush1.msra.mxu0 %v324_v12  ;;  %495 = vmatprep.subr.mxu1 %v393_v25  ;;  %v313_v34 = vld [vmem:[#allocation3 + $0x48] sm:$0xff]  ;;  %v312_v36 = vld [vmem:[#allocation3 + $0x40] sm:$0xff]  ;;  %v387_v37 = vld [vmem:[#allocation3 + $0x298] sm:$0xff]  ;;  %p1303_p10 = pneg %p1302_p9 }
  0x31   : > { %424 = vmatprep.subr.mxu0 %v323_v13  ;;  %496 = vmatpush1.msra.mxu1 %v392_v27  ;;  %v311_v38 = vld [vmem:[#allocation3 + $0x38] sm:$0xff]  ;;  %v386_v39 = vld [vmem:[#allocation3 + $0x290] sm:$0xff]  ;;  %v385_v41 = vld [vmem:[#allocation3 + $0x288] sm:$0xff] }
  0x32   : > { %425 = vmatpush1.msra.mxu0 %v322_v14  ;;  %497 = vmatprep.subr.mxu1 %v391_v29  ;;  %v310_v40 = vld [vmem:[#allocation3 + $0x30] sm:$0xff]  ;;  %v309_v42 = vld [vmem:[#allocation3 + $0x28] sm:$0xff]  ;;  %v384_v43 = vld [vmem:[#allocation3 + $0x280] sm:$0xff] }
  0x33   : > { %426 = vmatprep.subr.mxu0 %v321_v17  ;;  %498 = vmatpush1.msra.mxu1 %v390_v31  ;;  %v308_v44 = vld [vmem:[#allocation3 + $0x20] sm:$0xff]  ;;  %v383_v45 = vld [vmem:[#allocation3 + $0x278] sm:$0xff]  ;;  %v382_v47 = vld [vmem:[#allocation3 + $0x270] sm:$0xff] }
  0x34   : > { %427 = vmatpush1.msra.mxu0 %v320_v19  ;;  %499 = vmatprep.subr.mxu1 %v389_v33  ;;  %v307_v46 = vld [vmem:[#allocation3 + $0x18] sm:$0xff]  ;;  %v306_v48 = vld [vmem:[#allocation3 + $0x10] sm:$0xff]  ;;  %v381_v49 = vld [vmem:[#allocation3 + $0x268] sm:$0xff] }
  0x35   : > { %428 = vmatprep.subr.mxu0 %v319_v22  ;;  %500 = vmatpush1.msra.mxu1 %v388_v35  ;;  %v305_v50 = vld [vmem:[#allocation3 + $0x8] sm:$0xff]  ;;  %v380_v51 = vld [vmem:[#allocation3 + $0x260] sm:$0xff]  ;;  %v379_v53 = vld [vmem:[#allocation3 + $0x258] sm:$0xff] }
  0x36   : > { %429 = vmatpush1.msra.mxu0 %v318_v24  ;;  %501 = vmatprep.subr.mxu1 %v387_v37  ;;  %v304_v52 = vld [vmem:[#allocation3] sm:$0xff]  ;;  %v367_v54 = vld [vmem:[#allocation3 + $0x1f8] sm:$0xff]  ;;  %v378_v55 = vld [vmem:[#allocation3 + $0x250] sm:$0xff] }
  0x37   : > { %430 = vmatprep.subr.mxu0 %v317_v26  ;;  %502 = vmatpush1.msra.mxu1 %v386_v39  ;;  %v366_v56 = vld [vmem:[#allocation3 + $0x1f0] sm:$0xff]  ;;  %v377_v57 = vld [vmem:[#allocation3 + $0x248] sm:$0xff]  ;;  %v376_v60 = vld [vmem:[#allocation3 + $0x240] sm:$0xff] }
  0x38   : > { %431 = vmatpush1.msra.mxu0 %v316_v28  ;;  %503 = vmatprep.subr.mxu1 %v385_v41  ;;  %v294_v58 = vld [vmem:[%s291_s8] sm:$0xff]  ;;  %v1492_v61 = vld [vmem:[%s291_s8 + $0x8] sm:$0xff]  ;;  %v364_v62 = vld [vmem:[#allocation3 + $0x1e0] sm:$0xff]  ;;  %s1370_s8 = smov [#allocation6]  }
  0x39   : > { %432 = vmatprep.subr.mxu0 %v315_v30  ;;  %504 = vmatpush1.msra.mxu1 %v384_v43  ;;  %v365_v59 = vld [vmem:[#allocation3 + $0x1e8] sm:$0xff]  ;;  %296 = vst [vmem:[#allocation2 + $0x1] sm:$0xff] %v294_v58  ;;  %v375_v63 = vld [vmem:[#allocation3 + $0x238] sm:$0xff]  ;;  %297 = vst [vmem:[#allocation2 + $0x9] sm:$0xff] %v1492_v61  ;;  %s1304_s9 = sshll.u32 %s1370_s8, 4  ;;  %s1305_s9 = int_to_ptr.vmem [resolvable:$false] %s1304_s9 }
  0x3a   : > { %433 = vmatpush1.msra.mxu0 %v314_v32  ;;  %505 = vmatprep.subr.mxu1 %v383_v45  ;;  %v363_v1 = vld [vmem:[#allocation3 + $0x1d8] sm:$0xff]  ;;  %v374_v2 = vld [vmem:[#allocation3 + $0x230] sm:$0xff]  ;;  %v373_v4 = vld [vmem:[#allocation3 + $0x228] sm:$0xff]  ;;  %s1306_s13 = scalar_lea.vmem %s1305_s9, 1024  ;;  %p1307_p11 = scmp.lt.s32.totalorder %s1865_s20, %s1305_s9 }
  0x3b   : > { %434 = vmatprep.subr.mxu0 %v313_v34  ;;  %506 = vmatpush1.msra.mxu1 %v382_v47  ;;  %v362_v3 = vld [vmem:[#allocation3 + $0x1d0] sm:$0xff]  ;;  %v361_v5 = vld [vmem:[#allocation3 + $0x1c8] sm:$0xff]  ;;  %v372_v6 = vld [vmem:[#allocation3 + $0x220] sm:$0xff]  ;;  %p1308_p12 = scmp.lt.s32.totalorder %s1306_s13, %s1300_s29 }
  0x3c   : > { %435 = vmatpush1.msra.mxu0 %v312_v36  ;;  %507 = vmatprep.subr.mxu1 %v381_v49  ;;  %v360_v7 = vld [vmem:[#allocation3 + $0x1c0] sm:$0xff]  ;;  %v371_v8 = vld [vmem:[#allocation3 + $0x218] sm:$0xff]  ;;  %v370_v10 = vld [vmem:[#allocation3 + $0x210] sm:$0xff] }
  0x3d   : > { %436 = vmatprep.subr.mxu0 %v311_v38  ;;  %508 = vmatpush1.msra.mxu1 %v380_v51  ;;  %v359_v9 = vld [vmem:[#allocation3 + $0x1b8] sm:$0xff]  ;;  %v358_v11 = vld [vmem:[#allocation3 + $0x1b0] sm:$0xff]  ;;  %v369_v12 = vld [vmem:[#allocation3 + $0x208] sm:$0xff]  ;;  %p1309_p13 = por %p1308_p12, %p1307_p11 }
  0x3e   : > { %437 = vmatpush1.msra.mxu0 %v310_v40  ;;  %509 = vmatprep.subr.mxu1 %v379_v53  ;;  %v357_v13 = vld [vmem:[#allocation3 + $0x1a8] sm:$0xff]  ;;  %v356_v14 = vld [vmem:[#allocation3 + $0x1a0] sm:$0xff]  ;;  %v355_v16 = vld [vmem:[#allocation3 + $0x198] sm:$0xff] }
  0x3f   : > { %438 = vmatprep.subr.mxu0 %v309_v42  ;;  %510 = vmatpush1.msra.mxu1 %v378_v55  ;;  %v368_v15 = vld [vmem:[#allocation3 + $0x200] sm:$0xff]  ;;  %v354_v18 = vld [vmem:[#allocation3 + $0x190] sm:$0xff]  ;;  %v353_v19 = vld [vmem:[#allocation3 + $0x188] sm:$0xff]  ;;  %p1310_p0 = pnand %p1309_p13, %p1303_p10 }
  0x40   : > { %439 = vmatpush1.msra.mxu0 %v308_v44  ;;  %511 = vmatprep.subr.mxu1 %v377_v57  ;;  %v302_v17 = vld [vmem:[#allocation2 + $0x2] sm:$0xff]  ;;  %v1498_v20 = vld [vmem:[%s1912_s3 + $0xf8] sm:$0xff]  ;;  %v351_v23 = vld [vmem:[#allocation3 + $0x178] sm:$0xff] }
  0x41   : > { %440 = vmatprep.subr.mxu0 %v307_v46  ;;  %512 = vmatpush1.msra.mxu1 %v376_v60  ;;  %v352_v21 = vld [vmem:[#allocation3 + $0x180] sm:$0xff]  ;;  %v303_v24 = vld [vmem:[#allocation2 + $0xa] sm:$0xff]  ;;  %v349_v27 = vld [vmem:[#allocation3 + $0x168] sm:$0xff] }
  0x42   : > { %441 = vmatpush1.msra.mxu0 %v306_v48  ;;  %513 = vmatprep.subr.mxu1 %v375_v63  ;;  %v1503_v22 = vld [vmem:[%s1912_s3 + $0x78] sm:$0xff]  ;;  %v350_v25 = vld [vmem:[#allocation3 + $0x170] sm:$0xff]  ;;  %v1510_v26 = vld [vmem:[%s1912_s3 + $0xf0] sm:$0xff] }
  0x43   : > { %442 = vmatprep.subr.mxu0 %v305_v50  ;;  %514 = vmatpush1.msra.mxu1 %v374_v2  ;;  %v1516_v28 = vld [vmem:[%s1912_s3 + $0x70] sm:$0xff]  ;;  %v348_v29 = vld [vmem:[#allocation3 + $0x160] sm:$0xff]  ;;  %v1521_v30 = vld [vmem:[%s1912_s3 + $0xe8] sm:$0xff] }
  0x44   : > { %443 = vmatpush1.msra.mxu0 %v304_v52  ;;  %515 = vmatprep.subr.mxu1 %v373_v4  ;;  %v347_v31 = vld [vmem:[#allocation3 + $0x158] sm:$0xff]  ;;  %v1527_v32 = vld [vmem:[%s1912_s3 + $0x68] sm:$0xff]  ;;  %v1533_v34 = vld [vmem:[%s1912_s3 + $0xe0] sm:$0xff] }
  0x45   : > { %444 = vmatprep.subr.mxu0 %v367_v54  ;;  %516 = vmatpush1.msra.mxu1 %v372_v6  ;;  %v346_v33 = vld [vmem:[#allocation3 + $0x150] sm:$0xff]  ;;  %v345_v35 = vld [vmem:[#allocation3 + $0x148] sm:$0xff]  ;;  %v344_v37 = vld [vmem:[#allocation3 + $0x140] sm:$0xff] }
  0x46   : > { %445 = vmatpush2.msra.mxu0 %v366_v56  ;;  %517 = vmatprep.subr.mxu1 %v371_v8  ;;  %v1539_v36 = vld [vmem:[%s1912_s3 + $0x60] sm:$0xff]  ;;  %v1545_v38 = vld [vmem:[%s1912_s3 + $0xd8] sm:$0xff]  ;;  %v343_v39 = vld [vmem:[#allocation3 + $0x138] sm:$0xff] }
  0x47   : > { %446 = vmatprep.subr.mxu0 %v365_v59  ;;  %518 = vmatpush1.msra.mxu1 %v370_v10  ;;  %v1551_v40 = vld [vmem:[%s1912_s3 + $0x58] sm:$0xff]  ;;  %v342_v41 = vld [vmem:[#allocation3 + $0x130] sm:$0xff]  ;;  %v1557_v42 = vld [vmem:[%s1912_s3 + $0xd0] sm:$0xff] }
  0x48   : > { %447 = vmatpush2.msra.mxu0 %v364_v62  ;;  %519 = vmatprep.subr.mxu1 %v369_v12  ;;  %v341_v43 = vld [vmem:[#allocation3 + $0x128] sm:$0xff]  ;;  %v1563_v44 = vld [vmem:[%s1912_s3 + $0x50] sm:$0xff]  ;;  %v340_v45 = vld [vmem:[#allocation3 + $0x120] sm:$0xff] }
  0x49   : > { %448 = vmatprep.subr.mxu0 %v363_v1  ;;  %476 = vmatprep.mubr.f32.mxu0 %v294_v58  ;;  %v1569_v46 = vld [vmem:[%s1912_s3 + $0xc8] sm:$0xff]  ;;  %v339_v47 = vld [vmem:[#allocation3 + $0x118] sm:$0xff]  ;;  %v1581_v50 = vld [vmem:[%s1912_s3 + $0xc0] sm:$0xff] }
  0x4a   : > { %449 = vmatpush2.msra.mxu0 %v362_v3  ;;  %520 = vmatpush1.msra.mxu1 %v368_v15  ;;  %v1575_v48 = vld [vmem:[%s1912_s3 + $0x48] sm:$0xff]  ;;  %v337_v51 = vld [vmem:[#allocation3 + $0x108] sm:$0xff]  ;;  %v336_v53 = vld [vmem:[#allocation3 + $0x100] sm:$0xff] }
  0x4b   : > { %450 = vmatprep.subr.mxu0 %v361_v5  ;;  %554 = vmatmul.mubr.f32.vlgmr.msra.gmra.mxu1 %v302_v17  ;;  %v338_v49 = vld [vmem:[#allocation3 + $0x110] sm:$0xff]  ;;  %v1587_v52 = vld [vmem:[%s1912_s3 + $0x40] sm:$0xff]  ;;  %v1593_v54 = vld [vmem:[%s1912_s3 + $0xb8] sm:$0xff] }
  0x4c   : > { %451 = vmatpush2.msra.mxu0 %v360_v7  ;;  %559 = vmatprep.mubr.f32.mxu1 %v1369_v0  ;;  %v298_v55 = vld [vmem:[#allocation2] sm:$0xff]  ;;  %v1599_v56 = vld [vmem:[%s1912_s3 + $0x38] sm:$0xff]  ;;  %v1605_v57 = vld [vmem:[%s1912_s3 + $0xb0] sm:$0xff] }
  0x4d   : > { %452 = vmatprep.subr.mxu0 %v359_v9  ;;  %1135 = vmatprep.subr.mxu1 %v1498_v20  ;;  %v1611_v58 = vld [vmem:[%s1912_s3 + $0x30] sm:$0xff]  ;;  %v1617_v59 = vld [vmem:[%s1912_s3 + $0xa8] sm:$0xff]  ;;  %v1630_v63 = vld [vmem:[%s1912_s3 + $0xa0] sm:$0xff] }
  0x4e   : > { %453 = vmatpush2.msra.mxu0 %v358_v11  ;;  %1136 = vmatpush3.msra.mxu1 %v1503_v22  ;;  %v299_v60 = vld [vmem:[#allocation2 + $0x8] sm:$0xff]  ;;  %v1645_v1 = vld [vmem:[%s1912_s3 + $0x98] sm:$0xff]  ;;  %v1657_v3 = vld [vmem:[%s1912_s3 + $0x90] sm:$0xff] }
  0x4f   : > { %454 = vmatprep.subr.mxu0 %v357_v13  ;;  %560 = vmatmul.mubr.f32.gmra.mxu1 %v303_v24  ;;  %v1624_v62 = vld [vmem:[%s1912_s3 + $0x28] sm:$0xff]  ;;  %v1651_v2 = vld [vmem:[%s1912_s3 + $0x18] sm:$0xff]  ;;  %v1663_v4 = vld [vmem:[%s1912_s3 + $0x10] sm:$0xff] }
  0x50   : > { %455 = vmatpush2.msra.mxu0 %v356_v14  ;;  %1137 = vmatprep.subr.mxu1 %v1510_v26  ;;  %v1669_v5 = vld [vmem:[%s1912_s3 + $0x88] sm:$0xff]  ;;  %v1681_v7 = vld [vmem:[%s1912_s3 + $0x80] sm:$0xff]  ;;  %v1694_v9 = vld [vmem:[%s1913_s4 + $0x78] sm:$0xff] }
  0x51   : > { %456 = vmatprep.subr.mxu0 %v355_v16  ;;  %1138 = vmatpush3.msra.mxu1 %v1516_v28  ;;  %v1675_v6 = vld [vmem:[%s1912_s3 + $0x8] sm:$0xff]  ;;  %v1687_v8 = vld [vmem:[%s1912_s3] sm:$0xff]  ;;  %v1699_v10 = vld [vmem:[%s1913_s4 + $0x70] sm:$0xff] }
  0x52   : > { %457 = vmatpush2.msra.mxu0 %v354_v18  ;;  %1139 = vmatprep.subr.mxu1 %v1521_v30  ;;  %v1704_v11 = vld [vmem:[%s1913_s4 + $0x68] sm:$0xff]  ;;  %v1710_v12 = vld [vmem:[%s1913_s4 + $0x60] sm:$0xff]  ;;  %v1716_v13 = vld [vmem:[%s1913_s4 + $0x58] sm:$0xff] }
  0x53   : > { %458 = vmatprep.subr.mxu0 %v353_v19  ;;  %1140 = vmatpush3.msra.mxu1 %v1527_v32  ;;  %v1722_v14 = vld [vmem:[%s1913_s4 + $0x50] sm:$0xff]  ;;  %v1728_v15 = vld [vmem:[%s1913_s4 + $0x48] sm:$0xff]  ;;  %v1734_v16 = vld [vmem:[%s1913_s4 + $0x40] sm:$0xff] }
  0x54   : > { %459 = vmatpush2.msra.mxu0 %v352_v21  ;;  %1141 = vmatprep.subr.mxu1 %v1533_v34  ;;  %v1740_v17 = vld [vmem:[%s1913_s4 + $0x38] sm:$0xff]  ;;  %v1746_v18 = vld [vmem:[%s1913_s4 + $0x30] sm:$0xff]  ;;  %v1752_v19 = vld [vmem:[%s1913_s4 + $0x28] sm:$0xff] }
  0x55   : > { %460 = vmatprep.subr.mxu0 %v351_v23  ;;  %1142 = vmatpush3.msra.mxu1 %v1539_v36  ;;  %v400_v24 = vld [vmem:[%s1911_s2] sm:$0x3] }
  0x56   : > { %461 = vmatpush2.msra.mxu0 %v350_v25  ;;  %1143 = vmatprep.subr.mxu1 %v1545_v38 }
  0x57   : > { %462 = vmatprep.subr.mxu0 %v349_v27  ;;  %1144 = vmatpush3.msra.mxu1 %v1551_v40 }
  0x58   : > { %463 = vmatpush2.msra.mxu0 %v348_v29  ;;  %1145 = vmatprep.subr.mxu1 %v1557_v42 }
  0x59   : > { %464 = vmatprep.subr.mxu0 %v347_v31  ;;  %1146 = vmatpush3.msra.mxu1 %v1563_v44 }
  0x5a   : > { %465 = vmatpush2.msra.mxu0 %v346_v33  ;;  %1147 = vmatprep.subr.mxu1 %v1569_v46 }
  0x5b   : > { %466 = vmatprep.subr.mxu0 %v345_v35  ;;  %1148 = vmatpush3.msra.mxu1 %v1575_v48 }
  0x5c   : > { %467 = vmatpush2.msra.mxu0 %v344_v37  ;;  %1149 = vmatprep.subr.mxu1 %v1581_v50 }
  0x5d   : > { %468 = vmatprep.subr.mxu0 %v343_v39  ;;  %1150 = vmatpush3.msra.mxu1 %v1587_v52 }
  0x5e   : > { %469 = vmatpush2.msra.mxu0 %v342_v41  ;;  %1151 = vmatprep.subr.mxu1 %v1593_v54 }
  0x5f   : > { %470 = vmatprep.subr.mxu0 %v341_v43  ;;  %1152 = vmatpush3.msra.mxu1 %v1599_v56 }
  0x60   : > { %471 = vmatpush2.msra.mxu0 %v340_v45  ;;  %1153 = vmatprep.subr.mxu1 %v1605_v57 }
  0x61   : > { %472 = vmatprep.subr.mxu0 %v339_v47  ;;  %1154 = vmatpush3.msra.mxu1 %v1611_v58 }
  0x62   : > { %473 = vmatpush2.msra.mxu0 %v338_v49  ;;  %1155 = vmatprep.subr.mxu1 %v1617_v59 }
  0x63   : > { %474 = vmatprep.subr.mxu0 %v337_v51  ;;  %1156 = vmatpush3.msra.mxu1 %v1624_v62 }
  0x64   : > { %475 = vmatpush2.msra.mxu0 %v336_v53  ;;  %1157 = vmatprep.subr.mxu1 %v1630_v63 }
  0x65   : > { %477 = vmatmul.mubr.f32.vlgmr.msra.gmra.mxu0 %v298_v55  ;;  %712 = vmatprep.subr.mxu0 %v1694_v9 }
  0x66   : > { %482 = vmatprep.mubr.f32.mxu0 %v1492_v61  ;;  %v1636_v61 = vld [vmem:[%s1912_s3 + $0x20] sm:$0xff]  ;;  %713 = vmatpush1.msra.mxu0 %v1699_v10 }
  0x67   : > { %1158 = vmatpush3.msra.mxu1 %v1636_v61  ;;  %714 = vmatprep.subr.mxu0 %v1704_v11 }
  0x68   : > { %1159 = vmatprep.subr.mxu1 %v1645_v1  ;;  %715 = vmatpush1.msra.mxu0 %v1710_v12 }
  0x69   : > { %483 = vmatmul.mubr.f32.gmra.mxu0 %v299_v60  ;;  %1160 = vmatpush3.msra.mxu1 %v1651_v2 }
  0x6a   : > { %760 = vmatprep.mubr.f32.mxu0 %v1369_v0  ;;  %1161 = vmatprep.subr.mxu1 %v1657_v3 }
  0x6b   : > { %1162 = vmatpush3.msra.mxu1 %v1663_v4  ;;  %716 = vmatprep.subr.mxu0 %v1716_v13 }
  0x6c   : > { %1163 = vmatprep.subr.mxu1 %v1669_v5  ;;  %717 = vmatpush1.msra.mxu0 %v1722_v14 }
  0x6d   : > { %1164 = vmatpush3.msra.mxu1 %v1675_v6  ;;  %718 = vmatprep.subr.mxu0 %v1728_v15 }
  0x6e   : > { %1165 = vmatprep.subr.mxu1 %v1681_v7  ;;  %719 = vmatpush1.msra.mxu0 %v1734_v16 }
  0x6f   : > { %1166 = vmatpush3.msra.mxu1 %v1687_v8  ;;  %720 = vmatprep.subr.mxu0 %v1740_v17 }
  0x70   : > { %1173 = vmatprep.subr.mxu1 %v1498_v20  ;;  %721 = vmatpush1.msra.mxu0 %v1746_v18  ;;  %v402_v20 = vlaneseq }
  0x71   : > { %722 = vmatprep.subr.mxu0 %v1752_v19 }
  0x72   : > { %v403_v21 = vshrl.u32 %v402_v20, 7 }
  0x74   : > { %v1757_v23 = vsub.s32 0, %v403_v21  ;;  %v1762_v25 = vsub.s32 1, %v403_v21 }
  0x76   : > { %v405_v29 = vrot.slane %v400_v24, %v1757_v23  ;;  %v409_v31 = vrot.slane %v400_v24, %v1762_v25 }
 0x10b   : > { %v555_v27 = vpop.f32.mrf.mxu1 }
 0x10d   : > { %v557_v35 = vpop.f32.mrf.mxu1 }
 0x10f   : > { %v561_v45 = vpop.f32.mrf.mxu1 }
 0x111   : > { %v563_v60 = vpop.f32.mrf.mxu1 }
 0x125   : > { %v478_v33 = vpop.f32.mrf.mxu0 }
 0x126   : > { %v479_v37 = vadd.f32 %v478_v33, %v405_v29 }
 0x127   : > { %v480_v39 = vpop.f32.mrf.mxu0 }
 0x128   : > { %v481_v41 = vadd.f32 %v480_v39, %v409_v31  ;;  %v1768_v49 = vadd.f32 %v555_v27, %v479_v37 }
 0x129   : > { %v484_v43 = vpop.f32.mrf.mxu0 }
 0x12a   : > { %v1766_v47 = vadd.f32 %v557_v35, %v481_v41  ;;  %v485_v51 = vadd.f32 %v484_v43, %v405_v29 }
 0x12b   : > { %v486_v53 = vpop.f32.mrf.mxu0 }
 0x12c   : > { %v487_v55 = vadd.f32 %v486_v53, %v409_v31  ;;  %678 = vmatprep.mubr.f32.mxu1 %v1766_v47  ;;  %v1775_v21 = vadd.f32 %v561_v45, %v485_v51 }
 0x12d   : > { %679 = vmatmul.mubr.f32.vlgmr.msra.gmra.mxu1 %v1768_v49 }
 0x12e   : > { %v1772_v20 = vadd.f32 %v563_v60, %v487_v55  ;;  %1174 = vmatpush3.msra.mxu1 %v1503_v22  ;;  %v602_v22 = vld [vmem:[%s1913_s4 + $0x20] sm:$0xff] }
 0x12f   : > { %1175 = vmatprep.subr.mxu1 %v1510_v26  ;;  %723 = vmatpush1.msra.mxu0 %v602_v22  ;;  %v601_v26 = vld [vmem:[%s1913_s4 + $0x18] sm:$0xff] }
 0x130   : > { %683 = vmatprep.mubr.f32.mxu1 %v1772_v20  ;;  %1176 = vmatpush3.msra.mxu1 %v1516_v28  ;;  %v600_v28 = vld [vmem:[%s1913_s4 + $0x10] sm:$0xff] }
 0x131   : > { %684 = vmatmul.mubr.f32.gmra.mxu1 %v1775_v21  ;;  %1177 = vmatprep.subr.mxu1 %v1521_v30  ;;  %v599_v30 = vld [vmem:[%s1913_s4 + $0x8] sm:$0xff] }
 0x132   : > { %1178 = vmatpush3.msra.mxu1 %v1527_v32  ;;  %724 = vmatprep.subr.mxu0 %v601_v26  ;;  %v598_v32 = vld [vmem:[%s1913_s4] sm:$0xff] }
 0x133   : > { %1179 = vmatprep.subr.mxu1 %v1533_v34  ;;  %725 = vmatpush1.msra.mxu0 %v600_v28 }
 0x134   : > { %1180 = vmatpush3.msra.mxu1 %v1539_v36  ;;  %726 = vmatprep.subr.mxu0 %v599_v30 }
 0x135   : > { %1181 = vmatprep.subr.mxu1 %v1545_v38  ;;  %727 = vmatpush1.msra.mxu0 %v598_v32 }
 0x136   : > { %1182 = vmatpush3.msra.mxu1 %v1551_v40  ;;  %878 = vmatprep.subr.mxu0 %v1694_v9 }
 0x137   : > { %1183 = vmatprep.subr.mxu1 %v1557_v42 }
 0x138   : > { %1184 = vmatpush3.msra.mxu1 %v1563_v44 }
 0x139   : > { %1185 = vmatprep.subr.mxu1 %v1569_v46 }
 0x13a   : > { %1186 = vmatpush3.msra.mxu1 %v1575_v48 }
 0x13b   : > { %1187 = vmatprep.subr.mxu1 %v1581_v50 }
 0x13c   : > { %1188 = vmatpush3.msra.mxu1 %v1587_v52 }
 0x13d   : > { %1189 = vmatprep.subr.mxu1 %v1593_v54 }
 0x13e   : > { %1190 = vmatpush3.msra.mxu1 %v1599_v56 }
 0x13f   : > { %1191 = vmatprep.subr.mxu1 %v1605_v57 }
 0x140   : > { %1192 = vmatpush3.msra.mxu1 %v1611_v58 }
 0x141   : > { %1193 = vmatprep.subr.mxu1 %v1617_v59 }
 0x142   : > { %1194 = vmatpush3.msra.mxu1 %v1624_v62 }
 0x143   : > { %1195 = vmatprep.subr.mxu1 %v1630_v63 }
 0x144   : > { %1196 = vmatpush3.msra.mxu1 %v1636_v61 }
 0x145   : > { %1197 = vmatprep.subr.mxu1 %v1645_v1 }
 0x146   : > { %1198 = vmatpush3.msra.mxu1 %v1651_v2 }
 0x147   : > { %1199 = vmatprep.subr.mxu1 %v1657_v3 }
 0x148   : > { %1200 = vmatpush3.msra.mxu1 %v1663_v4 }
 0x149   : > { %1201 = vmatprep.subr.mxu1 %v1669_v5 }
 0x14a   : > { %1202 = vmatpush3.msra.mxu1 %v1675_v6 }
 0x14b   : > { %1203 = vmatprep.subr.mxu1 %v1681_v7 }
 0x14c   : > { %1204 = vmatpush3.msra.mxu1 %v1687_v8 }
 0x1ed   : > { %v1167_v34 = vpop.f32.mrf.mxu1 }
 0x1ef   : > { %v1168_v36 = vpop.f32.mrf.mxu1 }
 0x1f0   : > { %v1169_v38 = vadd.f32 %v1168_v36, %v1167_v34 }
 0x1f1   : > { %v1170_v40 = vpop.f32.mrf.mxu1 }
 0x1f2   : > { %1120 = vmatmul.mubr.msk.f32.vlgmr.msra.gmra.mxu0 %vm689_vm0, %v1169_v38 }
 0x1f3   : > { %v1171_v42 = vpop.f32.mrf.mxu1  ;;  %766 = vmatprep.mubr.f32.mxu0 %v1369_v0  ;;  %879 = vmatpush1.msra.mxu0 %v1699_v10 }
 0x1f4   : > { %v1172_v44 = vadd.f32 %v1171_v42, %v1170_v40  ;;  %880 = vmatprep.subr.mxu0 %v1704_v11 }
 0x1f5   : > { %881 = vmatpush1.msra.mxu0 %v1710_v12 }
 0x1f6   : > { %1121 = vmatmul.mubr.msk.f32.gmra.mxu0 %vm689_vm0, %v1172_v44  ;;  %882 = vmatprep.subr.mxu0 %v1716_v13 }
 0x1f7   : > { %883 = vmatpush1.msra.mxu0 %v1722_v14  ;;  %926 = vmatprep.mubr.f32.mxu0 %v1369_v0 }
 0x1f8   : > { %884 = vmatprep.subr.mxu0 %v1728_v15 }
 0x1f9   : > { %885 = vmatpush1.msra.mxu0 %v1734_v16 }
 0x1fa   : > { %886 = vmatprep.subr.mxu0 %v1740_v17  ;;  %v963_v17 = vld [vmem:[%s1915_s6] sm:$0x3] }
 0x1fb   : > { %887 = vmatpush1.msra.mxu0 %v1746_v18  ;;  %v968_v27 = vrot.slane %v963_v17, %v1757_v23  ;;  %v972_v29 = vrot.slane %v963_v17, %v1762_v25 }
 0x1fc   : > { %888 = vmatprep.subr.mxu0 %v1752_v19 }
 0x1fd   : > { %889 = vmatpush1.msra.mxu0 %v602_v22 }
 0x1fe   : > { %890 = vmatprep.subr.mxu0 %v601_v26 }
 0x1ff   : > { %891 = vmatpush1.msra.mxu0 %v600_v28 }
 0x200   : > { %892 = vmatprep.subr.mxu0 %v599_v30 }
 0x201   : > { %893 = vmatpush1.msra.mxu0 %v598_v32 }
 0x2b2   : > { %v762_v46 = vpop.f32.mrf.mxu0 }
 0x2b3   : > { %v773_v48 = vsub.f32 %v1768_v49, %v762_v46 }
 0x2b4   : > { %v764_v50 = vpop.f32.mrf.mxu0 }
 0x2b5   : > { %v774_v52 = vsub.f32 %v1766_v47, %v764_v50  ;;  %v777_v57 = vmul.f32 %v773_v48, %v773_v48 }
 0x2b6   : > { %v768_v54 = vpop.f32.mrf.mxu0 }
 0x2b7   : > { %v778_v56 = vmul.f32 %v774_v52, %v774_v52  ;;  %v775_v58 = vsub.f32 %v1775_v21, %v768_v54 }
 0x2b8   : > { %v770_v59 = vpop.f32.mrf.mxu0 }
 0x2b9   : > { %v776_v62 = vsub.f32 %v1772_v20, %v770_v59  ;;  %845 = vmatprep.mubr.f32.mxu1 %v778_v56  ;;  %v779_v61 = vmul.f32 %v775_v58, %v775_v58 }
 0x2ba   : > { %846 = vmatmul.mubr.f32.vlgmr.msra.gmra.mxu1 %v777_v57 }
 0x2bb   : > { %v780_v63 = vmul.f32 %v776_v62, %v776_v62 }
 0x2bd   : > { %850 = vmatprep.mubr.f32.mxu1 %v780_v63 }
 0x2be   : > { %851 = vmatmul.mubr.f32.gmra.mxu1 %v779_v61 }
 0x37a   : > { %v1205_v1 = vpop.f32.mrf.mxu1 }
 0x37c   : > { %v1206_v2 = vpop.f32.mrf.mxu1 }
 0x37d   : > { %v1207_v3 = vadd.f32 %v1206_v2, %v1205_v1 }
 0x37e   : > { %v1208_v4 = vpop.f32.mrf.mxu1 }
 0x37f   : > { %1122 = vmatmul.mubr.msk.f32.vlgmr.msra.gmra.mxu0 %vm689_vm0, %v1207_v3 }
 0x380   : > { %v1209_v5 = vpop.f32.mrf.mxu1  ;;  %932 = vmatprep.mubr.f32.mxu0 %v1369_v0  ;;  %v947_v0 = vld [vmem:[%s1914_s5] sm:$0x3] }
 0x381   : > { %v1210_v6 = vadd.f32 %v1209_v5, %v1208_v4  ;;  %v952_v15 = vrot.slane %v947_v0, %v1757_v23  ;;  %v956_v18 = vrot.slane %v947_v0, %v1762_v25 }
 0x383   : > { %1123 = vmatmul.mubr.msk.f32.gmra.mxu0 %vm689_vm0, %v1210_v6 }
 0x43f   : > { %v928_v7 = vpop.f32.mrf.mxu0 }
 0x440   : > { %v929_v8 = vadd.f32 1e-05, %v928_v7 }
 0x441   : > { %v930_v9 = vpop.f32.mrf.mxu0 }
 0x442   : > { %1266 = vrsqrt.f32 %v929_v8  ;;  %v931_v10 = vadd.f32 1e-05, %v930_v9 }
 0x443   : > { %v934_v11 = vpop.f32.mrf.mxu0 }
 0x444   : > { %1268 = vrsqrt.f32 %v931_v10  ;;  %v935_v12 = vadd.f32 1e-05, %v934_v11 }
 0x445   : > { %v936_v13 = vpop.f32.mrf.mxu0 }
 0x446   : > { %1270 = vrsqrt.f32 %v935_v12  ;;  %v937_v14 = vadd.f32 1e-05, %v936_v13 }
 0x448   : > { %1272 = vrsqrt.f32 %v937_v14 }
 0x44f   : > { %v1267_v16 = vpop.eup %1266 }
 0x450   : > { %v943_v19 = vmul.f32 %v1267_v16, %v773_v48 }
 0x451   : > { %v1269_v24 = vpop.eup %1268 }
 0x452   : > { %v959_v31 = vmul.f32 %v952_v15, %v943_v19  ;;  %v944_v33 = vmul.f32 %v1269_v24, %v774_v52 }
 0x453   : > { %v1271_v35 = vpop.eup %1270 }
 0x454   : > { %v960_v37 = vmul.f32 %v956_v18, %v944_v33  ;;  %v945_v39 = vmul.f32 %v1271_v35, %v775_v58  ;;  %v975_v43 = vadd.f32 %v968_v27, %v959_v31 }
 0x455   : > { %v1273_v41 = vpop.eup %1272 }
 0x456   : > { %v976_v45 = vadd.f32 %v972_v29, %v960_v37  ;;  %v961_v47 = vmul.f32 %v952_v15, %v945_v39  ;;  %v946_v49 = vmul.f32 %v1273_v41, %v776_v62 }
 0x458   : > { %v983_v51 = vcombine.low %v975_v43, %v976_v45  ;;  %v984_v53 = vcombine.high %v975_v43, %v976_v45  ;;  %v962_v55 = vmul.f32 %v956_v18, %v946_v49  ;;  %v977_v23 = vadd.f32 %v968_v27, %v961_v47 }
 0x45a   : > { %v978_v25 = vadd.f32 %v972_v29, %v962_v55  ;;  %1124 = vst.sshfl [vmem:[%s286_s19] sm:$0xff pattern:$0x75316420] %v983_v51  ;;  %1125 = vst.sshfl [vmem:[%s286_s19 + $0x8] sm:$0xff pattern:$0x75316420] %v984_v53 }
 0x45c   : > { %v985_v60 = vcombine.low %v977_v23, %v978_v25  ;;  %v986_v20 = vcombine.high %v977_v23, %v978_v25 }
 0x45e   : > { %1126 = vst.sshfl [vmem:[%s286_s19 + $0x10] sm:$0xff pattern:$0x75316420] %v985_v60  ;;  %1127 = vst.sshfl [vmem:[%s286_s19 + $0x18] sm:$0xff pattern:$0x75316420] %v986_v20 }
 0x45f   : > { %1313 = shalt.err (!%p1310_p0)
}
 0x460   : > { %s1314_s14 = scalar_lea.hbm %s1863_s23, 512  ;;  %s1318_s17 = scalar_lea.hbm %s1916_s7, 1024 }
 0x461   : > { %p1315_p1 = scmp.ne.s32.totalorder %s1863_s23, %s1314_s14  ;;  %p1319_p4 = scmp.lt.s32.totalorder %s1863_s23, %s1916_s7 }
 0x462   : > { %p1320_p7 = scmp.lt.s32.totalorder %s1318_s17, %s1314_s14 }
 0x463   : > { %p1316_p2 = pnand %p1315_p1, %p1451_p5 }
 0x464   : > { %p1321_p6 = por %p1320_p7, %p1319_p4 }
 0x465   : > { %p1317_p3 = pneg %p1316_p2 }
 0x467   : > { %p1322_p8 = pnand %p1321_p6, %p1317_p3 }
 0x469   : > { %1325 = shalt.err (!%p1322_p8)
}
 0x46a   : > { %s1371_s21 = smov 128   ;;  %s1372_s22 = smov 8  }
 0x46b   : > { %1215 = dma.vmem_to_hbm [thread:$0]  (%p1451_p5), %s1865_s20, 512, %s1863_s23, %s1869_s28, %s1371_s21, %s1371_s21, %s1372_s22  }
 0x46c PF: > { %p1227_p9 = scmp.ge.s32.totalorder %s1364_s27, 2  ;;  %s1052_s29 = sand.u32 1, %s1352_s24  }
 0x46d   : > { %p1920_p10 = scmp.ne.s32.totalorder %s1918_s12, 0  ;;  %s1053_s8 = scalar_lea.sflag [#allocation5], %s1052_s29 }
 0x46f   : > { %p1222_p11 = pnand %p1227_p9, %p1920_p10 }
 0x471   : > { %p1223_p12 = pneg %p1222_p11 }
 0x473   : > { %1347 = dma.done.wait (%p1223_p12), %s1053_s8, 512  }
 0x474   : > { %1349 = vsyncadd (%p1223_p12), %s1053_s8, 4294966784  ;;  %p18_p13 = scmp.ge.s32.totalorder %s1438_s30, 4   ;;  %s1921_s24 = smov %s1356_s25 }
 0x475   : > { %s1922_s25 = smov %s1360_s26  ;;  %s1923_s26 = smov %s1449_s10 }
 0x476   : > { %s1924_s27 = smov %s1438_s30  ;;  %20 = sbr.rel (!%p18_p13) target bundleno = 4 (0x4), region = 88 }
 0x47b   :  { %1058 = vsyncpa [#allocation4], 1 }
 0x47c   :  { %1060 = vsyncpa [#allocation4 + $0x1], 1 }
 0x47d   :  { %1061 = vsyncpa [#allocation5], 1 }
 0x47e   :  { %1063 = vsyncpa [#allocation5 + $0x1], 1 }

</bundles_post_ra>
